<compile_context>
chip_gen: v7x
topology: tpu7x:2x2x1
jax: 0.10.0
libtpu: 0.0.40
codegen_flags: <defaults>
</compile_context>

<pallas_src>
import functools

import jax
import jax.numpy as jnp
from jax.experimental import pallas as pl
from jax.experimental.pallas import tpu as pltpu


def _round_up(x, m):
    return ((x + m - 1) // m) * m


def vision_adapter_kernel(x_ref, wd_ref, bd_ref, wu_ref, bu_ref, g_ref, beta_ref,
                          o_ref, *, compute_dtype, act_dtype, approximate_gelu):
    # x tile in its native (HBM) dtype; cast once for the MXU, keep the original
    # for the full-precision residual.
    x = x_ref[...]
    xc = x.astype(compute_dtype)

    # down_project: (TM, H) @ (H, A) with f32 accumulation on the MXU.
    h = jnp.dot(xc, wd_ref[...], preferred_element_type=jnp.float32)
    h = (h + bd_ref[...]).astype(act_dtype)

    # GELU on the (TM, A) intermediate.  act_dtype is bf16 on v6e/v7x (2x VALU
    # packing, EUP tanh) and f32 whenever the compute dtype is f32.
    if approximate_gelu:
        # tanh form -> EUP transcendental slot (co-issues with MXU/VALU work).
        c = 0.7978845608028654          # sqrt(2/pi)
        h = 0.5 * h * (1.0 + jnp.tanh(c * (h + 0.044715 * (h * h * h))))
    else:
        # exact erf form, matches torch.nn.GELU() default.
        h = 0.5 * h * (1.0 + jax.lax.erf(h * 0.7071067811865476))

    # up_project: back to the MXU dtype, accumulate in f32.
    h = jnp.dot(h.astype(wu_ref.dtype), wu_ref[...],
                preferred_element_type=jnp.float32)
    h = h + bu_ref[...]

    # residual add + LayerNorm over the last dim in f32 (eps=1e-5, affine).
    # Variance via d = y - mean; d is reused for the normalize, so this costs the
    # same as the single-pass E[y^2]-mean^2 form without its cancellation risk.
    y = h + x.astype(jnp.float32)
    inv_h = jnp.float32(1.0 / y.shape[-1])
    mean = jnp.sum(y, axis=-1, keepdims=True) * inv_h
    d = y - mean
    var = jnp.sum(d * d, axis=-1, keepdims=True) * inv_h
    out = d * jax.lax.rsqrt(var + jnp.float32(1e-5)) * g_ref[...] + beta_ref[...]

    o_ref[...] = out.astype(o_ref.dtype)


def vision_adapter(hidden_states, w_down, b_down, w_up, b_up, gamma, beta, *,
                   tm=None, compute_dtype=None, activation_dtype=None,
                   approximate_gelu=True):
    """hidden_states: (B, S, H). Returns (B, S, H) in the input dtype.

    compute_dtype: dtype of the MXU operands (weights + cast of x). Pass
      jnp.bfloat16 in production; accumulation and residual+LayerNorm are f32.
    activation_dtype: dtype of the GELU elementwise math. Defaults to f32 when
      compute is f32, else compute_dtype (pass jnp.float32 explicitly on v5e,
      which has no bf16 VALU/EUP).
    approximate_gelu: tanh GELU (EUP slot) is the production default. Use False
      for exact-erf bit-parity with torch.nn.GELU().
    """
    B, S, H = hidden_states.shape
    A = w_down.shape[1]
    N = B * S
    in_dtype = hidden_states.dtype
    cdt = jnp.dtype(compute_dtype) if compute_dtype is not None else jnp.dtype(in_dtype)
    if activation_dtype is not None:
        adt = jnp.dtype(activation_dtype)
    else:
        adt = jnp.dtype(jnp.float32) if cdt == jnp.dtype("float32") else cdt

    # --- row tiling: big sublane-aligned tiles (512 / 1024 rows) for HBM-roofline
    # streaming; clamp so the "parallel" grid keeps >= 4 steps so both v7x
    # TensorCores stay busy even for small N.
    if tm is None:
        tm = 1024 if N >= 4096 else 512
    tm_req = max(8, _round_up(tm, 8))
    tm_par = max(8, _round_up(pl.cdiv(N, 4), 8))
    tm_eff = min(tm_req, tm_par)
    grid_m = pl.cdiv(N, tm_eff)            # last tile may be partial (masked writes)

    # x streams in its native dtype: no wrapper-side cast / pad / slice copies.
    x2d = hidden_states.reshape(N, H)

    # --- lane-dense adapter dim: pad A to a multiple of 128 (exact: padded columns
    # get zero weights + zero bias -> gelu(0)=0 -> zero contribution).
    a_pad = _round_up(A, 128)
    wd = w_down.astype(cdt)
    wu = w_up.astype(cdt)
    bd = b_down.astype(jnp.float32)
    if a_pad != A:
        wd = jnp.pad(wd, ((0, 0), (0, a_pad - A)))
        wu = jnp.pad(wu, ((0, a_pad - A), (0, 0)))
        bd = jnp.pad(bd, ((0, a_pad - A),))
    bd2 = bd.reshape(1, a_pad)
    bu2 = b_up.astype(jnp.float32).reshape(1, H)
    g2 = gamma.astype(jnp.float32).reshape(1, H)
    be2 = beta.astype(jnp.float32).reshape(1, H)

    # --- VMEM budget derived from hardware capacity with headroom: <= 3/4 of
    # capacity (~48 MiB on v7x's 64 MiB, up to ~96 MiB on v5e/v6e's 128 MiB).
    try:
        vmem_cap = int(getattr(pltpu.get_tpu_info(), "vmem_capacity_bytes", 64 << 20))
    except Exception:  # trace-time query unavailable (e.g. interpret mode)
        vmem_cap = 64 << 20
    x_item = jnp.dtype(in_dtype).itemsize
    c_item = cdt.itemsize
    x_bufs = int(min(3, max(2, grid_m)))            # deeper buffering on streamed x
    weight_bytes = 2 * (2 * H * a_pad) * c_item     # safe even if fallback double-buffers
    param_bytes = 2 * (a_pad + 3 * H) * 4
    tile_bytes = (x_bufs + 2) * tm_eff * H * x_item
    interm_bytes = tm_eff * (a_pad + 2 * H) * 4     # rough f32 temporaries
    est = weight_bytes + param_bytes + tile_bytes + interm_bytes
    vmem_limit = int(min(max(2 * est, 8 << 20), (vmem_cap * 3) // 4))

    # --- cost estimate so XLA schedules the surrounding graph sensibly.
    cost = pl.CostEstimate(
        flops=2 * 2 * N * H * a_pad,                 # two matmuls
        transcendentals=N * a_pad,                   # one erf/tanh per GELU element
        bytes_accessed=(2 * N * H * x_item + 2 * H * a_pad * c_item
                        + (a_pad + 3 * H) * 4),
    )

    kernel = functools.partial(vision_adapter_kernel,
                               compute_dtype=cdt, act_dtype=adt,
                               approximate_gelu=approximate_gelu)

    def _call(use_pipeline_mode):
        if use_pipeline_mode:
            resident = dict(pipeline_mode=pl.Buffered(1))     # constant index_map -> 1 buffer
            streamed = dict(pipeline_mode=pl.Buffered(x_bufs))
        else:
            resident = {}
            streamed = {}
        in_specs = [
            pl.BlockSpec((tm_eff, H), lambda i: (i, 0), **streamed),   # x tile (streamed)
            pl.BlockSpec((H, a_pad), lambda i: (0, 0), **resident),    # w_down (resident)
            pl.BlockSpec((1, a_pad), lambda i: (0, 0), **resident),    # b_down (f32)
            pl.BlockSpec((a_pad, H), lambda i: (0, 0), **resident),    # w_up (resident)
            pl.BlockSpec((1, H), lambda i: (0, 0), **resident),        # b_up (f32)
            pl.BlockSpec((1, H), lambda i: (0, 0), **resident),        # ln gamma (f32)
            pl.BlockSpec((1, H), lambda i: (0, 0), **resident),        # ln beta (f32)
        ]
        out_specs = pl.BlockSpec((tm_eff, H), lambda i: (i, 0))
        return pl.pallas_call(
            kernel,
            out_shape=jax.ShapeDtypeStruct((N, H), in_dtype),
            grid_spec=pltpu.PrefetchScalarGridSpec(
                num_scalar_prefetch=0,
                grid=(grid_m,),
                in_specs=in_specs,
                out_specs=out_specs,
            ),
            compiler_params=pltpu.CompilerParams(
                dimension_semantics=("parallel",),
                vmem_limit_bytes=vmem_limit),
            cost_estimate=cost,
        )(x2d, wd, bd2, wu, bu2, g2, be2)

    try:
        out2d = _call(True)
    except Exception:
        # Fallback for environments where BlockSpec(pipeline_mode=...) is rejected;
        # identical math, default double-buffering everywhere.
        out2d = _call(False)

    return out2d.reshape(B, S, H)


def init_params(key, hidden_size, adapter_size, dtype=jnp.float32):
    k1, k2, k3, k4 = jax.random.split(key, 4)
    lim_d = 1.0 / jnp.sqrt(hidden_size)
    lim_u = 1.0 / jnp.sqrt(adapter_size)
    w_down = jax.random.uniform(k1, (hidden_size, adapter_size), dtype, -lim_d, lim_d)
    b_down = jax.random.uniform(k2, (adapter_size,), dtype, -lim_d, lim_d)
    w_up = jax.random.uniform(k3, (adapter_size, hidden_size), dtype, -lim_u, lim_u)
    b_up = jax.random.uniform(k4, (hidden_size,), dtype, -lim_u, lim_u)
    gamma = jnp.ones((hidden_size,), dtype)
    beta = jnp.zeros((hidden_size,), dtype)
    return w_down, b_down, w_up, b_up, gamma, beta


def reference(hidden_states, w_down, b_down, w_up, b_up, gamma, beta, *,
              approximate=False):
    x = hidden_states.astype(jnp.float32)
    h = x @ w_down.astype(jnp.float32) + b_down.astype(jnp.float32)
    h = jax.nn.gelu(h, approximate=approximate)
    h = h @ w_up.astype(jnp.float32) + b_up.astype(jnp.float32)
    y = h + x
    mean = jnp.mean(y, axis=-1, keepdims=True)
    var = jnp.mean((y - mean) ** 2, axis=-1, keepdims=True)
    return ((y - mean) * jax.lax.rsqrt(var + 1e-5)) * gamma + beta


if __name__ == "__main__":
    B, S, H, A = 2, 8, 32, 16
    key = jax.random.PRNGKey(0)
    kx, kp = jax.random.split(key)
    x = jax.random.normal(kx, (B, S, H), jnp.float32)
    params = init_params(kp, H, A)
    ref_erf = reference(x, *params, approximate=False)
    ref_tanh = reference(x, *params, approximate=True)

    # 1) f32 path, exact-erf GELU (bit-parity with torch.nn.GELU default).
    out = jax.block_until_ready(vision_adapter(x, *params, approximate_gelu=False))
    assert out.shape == (B, S, H)
    assert jnp.allclose(out, ref_erf, atol=1e-5, rtol=1e-5)

    # 2) production default: tanh GELU (EUP slot).
    out_t = jax.block_until_ready(vision_adapter(x, *params))
    assert jnp.allclose(out_t, ref_tanh, atol=1e-3, rtol=1e-3)

    # 3) partial-last-tile path: N not a multiple of the row tile (masked writes,
    #    no wrapper-side padding / slicing copies).
    x_odd = x[:, :7, :]
    out_odd = jax.block_until_ready(
        vision_adapter(x_odd, *params, approximate_gelu=False))
    assert jnp.allclose(out_odd, ref_erf[:, :7, :], atol=1e-5, rtol=1e-5)

    # 4) production-style bf16 MXU operands + bf16 GELU (f32 accumulation,
    #    f32 residual + LayerNorm, residual uses the full-precision input).
    out_bf16 = jax.block_until_ready(
        vision_adapter(x, *params, compute_dtype=jnp.bfloat16))
    assert jnp.allclose(out_bf16.astype(jnp.float32), ref_tanh, atol=5e-2, rtol=5e-2)

    print("KERNEL_OK")
</pallas_src>

<mosaic_0001>
module attributes {stable_mosaic.version = 11 : i64} {
  func.func @vision_adapter_kernel(%arg0: i32, %arg1: memref<8x32xf32, #tpu.memory_space<vmem>>, %arg2: memref<32x128xf32, #tpu.memory_space<vmem>>, %arg3: memref<1x128xf32, #tpu.memory_space<vmem>>, %arg4: memref<128x32xf32, #tpu.memory_space<vmem>>, %arg5: memref<1x32xf32, #tpu.memory_space<vmem>>, %arg6: memref<1x32xf32, #tpu.memory_space<vmem>>, %arg7: memref<1x32xf32, #tpu.memory_space<vmem>>, %arg8: memref<8x32xf32, #tpu.memory_space<vmem>>) attributes {dimension_semantics = [#tpu.dimension_semantics<parallel>], iteration_bounds = array<i64: 2>, scalar_prefetch = 0 : i64, scratch_operands = 0 : i64, tpu.core_type = #tpu.core_type<tc>, window_params = [{pipeline_mode = #tpu.pipeline_mode<double_buffered>, transform_indices = @transform_0, window_bounds = array<i64: 8, 32>}, {pipeline_mode = #tpu.pipeline_mode<synchronous>, transform_indices = @transform_1, window_bounds = array<i64: 32, 128>}, {pipeline_mode = #tpu.pipeline_mode<synchronous>, transform_indices = @transform_2, window_bounds = array<i64: 1, 128>}, {pipeline_mode = #tpu.pipeline_mode<synchronous>, transform_indices = @transform_3, window_bounds = array<i64: 128, 32>}, {pipeline_mode = #tpu.pipeline_mode<synchronous>, transform_indices = @transform_4, window_bounds = array<i64: 1, 32>}, {pipeline_mode = #tpu.pipeline_mode<synchronous>, transform_indices = @transform_5, window_bounds = array<i64: 1, 32>}, {pipeline_mode = #tpu.pipeline_mode<synchronous>, transform_indices = @transform_6, window_bounds = array<i64: 1, 32>}, {transform_indices = @transform_7, window_bounds = array<i64: 8, 32>}]} {
    %c0 = arith.constant 0 : index
    %c0_0 = arith.constant 0 : index
    %0 = vector.load %arg1[%c0, %c0_0] : memref<8x32xf32, #tpu.memory_space<vmem>>, vector<8x32xf32>
    %c0_1 = arith.constant 0 : index
    %c0_2 = arith.constant 0 : index
    %1 = vector.load %arg2[%c0_1, %c0_2] : memref<32x128xf32, #tpu.memory_space<vmem>>, vector<32x128xf32>
    %cst = arith.constant dense<0.000000e+00> : vector<8x128xf32>
    %2 = tpu.matmul %0, %1, %cst {dimension_numbers = #tpu.dot_dimension_numbers<[1], [0], [0], [1], [0, 0, 1, 1], [], []>} : vector<8x32xf32>, vector<32x128xf32>, vector<8x128xf32> -> vector<8x128xf32>
    %c0_3 = arith.constant 0 : index
    %c0_4 = arith.constant 0 : index
    %3 = vector.load %arg3[%c0_3, %c0_4] : memref<1x128xf32, #tpu.memory_space<vmem>>, vector<1x128xf32>
    %4 = vector.broadcast %3 : vector<1x128xf32> to vector<8x128xf32>
    %5 = arith.addf %2, %4 : vector<8x128xf32>
    %cst_5 = arith.constant 5.000000e-01 : f32
    %6 = vector.broadcast %cst_5 : f32 to vector<8x128xf32>
    %7 = arith.mulf %6, %5 : vector<8x128xf32>
    %cst_6 = arith.constant 0.707106769 : f32
    %8 = vector.broadcast %cst_6 : f32 to vector<8x128xf32>
    %9 = arith.mulf %5, %8 : vector<8x128xf32>
    %10 = math.erf %9 : vector<8x128xf32>
    %cst_7 = arith.constant 1.000000e+00 : f32
    %11 = vector.broadcast %cst_7 : f32 to vector<8x128xf32>
    %12 = arith.addf %11, %10 : vector<8x128xf32>
    %13 = arith.mulf %7, %12 : vector<8x128xf32>
    %c0_8 = arith.constant 0 : index
    %c0_9 = arith.constant 0 : index
    %14 = vector.load %arg4[%c0_8, %c0_9] : memref<128x32xf32, #tpu.memory_space<vmem>>, vector<128x32xf32>
    %cst_10 = arith.constant dense<0.000000e+00> : vector<8x32xf32>
    %15 = tpu.matmul %13, %14, %cst_10 {dimension_numbers = #tpu.dot_dimension_numbers<[1], [0], [0], [1], [0, 0, 1, 1], [], []>} : vector<8x128xf32>, vector<128x32xf32>, vector<8x32xf32> -> vector<8x32xf32>
    %c0_11 = arith.constant 0 : index
    %c0_12 = arith.constant 0 : index
    %16 = vector.load %arg5[%c0_11, %c0_12] : memref<1x32xf32, #tpu.memory_space<vmem>>, vector<1x32xf32>
    %17 = vector.broadcast %16 : vector<1x32xf32> to vector<8x32xf32>
    %18 = arith.addf %15, %17 : vector<8x32xf32>
    %19 = arith.addf %18, %0 : vector<8x32xf32>
    %cst_13 = arith.constant dense<0.000000e+00> : vector<8xf32>
    %20 = vector.multi_reduction <add>, %19, %cst_13 [1] : vector<8x32xf32> to vector<8xf32>
    %21 = vector.shape_cast %20 : vector<8xf32> to vector<8x1xf32>
    %cst_14 = arith.constant 3.125000e-02 : f32
    %22 = vector.broadcast %cst_14 : f32 to vector<8x1xf32>
    %23 = arith.mulf %21, %22 : vector<8x1xf32>
    %24 = vector.broadcast %23 : vector<8x1xf32> to vector<8x32xf32>
    %25 = arith.subf %19, %24 : vector<8x32xf32>
    %26 = arith.mulf %25, %25 : vector<8x32xf32>
    %cst_15 = arith.constant dense<0.000000e+00> : vector<8xf32>
    %27 = vector.multi_reduction <add>, %26, %cst_15 [1] : vector<8x32xf32> to vector<8xf32>
    %28 = vector.shape_cast %27 : vector<8xf32> to vector<8x1xf32>
    %cst_16 = arith.constant 3.125000e-02 : f32
    %29 = vector.broadcast %cst_16 : f32 to vector<8x1xf32>
    %30 = arith.mulf %28, %29 : vector<8x1xf32>
    %cst_17 = arith.constant 9.99999974E-6 : f32
    %31 = vector.broadcast %cst_17 : f32 to vector<8x1xf32>
    %32 = arith.addf %30, %31 : vector<8x1xf32>
    %33 = math.rsqrt %32 : vector<8x1xf32>
    %34 = vector.broadcast %33 : vector<8x1xf32> to vector<8x32xf32>
    %35 = arith.mulf %25, %34 : vector<8x32xf32>
    %c0_18 = arith.constant 0 : index
    %c0_19 = arith.constant 0 : index
    %36 = vector.load %arg6[%c0_18, %c0_19] : memref<1x32xf32, #tpu.memory_space<vmem>>, vector<1x32xf32>
    %37 = vector.broadcast %36 : vector<1x32xf32> to vector<8x32xf32>
    %38 = arith.mulf %35, %37 : vector<8x32xf32>
    %c0_20 = arith.constant 0 : index
    %c0_21 = arith.constant 0 : index
    %39 = vector.load %arg7[%c0_20, %c0_21] : memref<1x32xf32, #tpu.memory_space<vmem>>, vector<1x32xf32>
    %40 = vector.broadcast %39 : vector<1x32xf32> to vector<8x32xf32>
    %41 = arith.addf %38, %40 : vector<8x32xf32>
    %c0_22 = arith.constant 0 : index
    %c0_23 = arith.constant 0 : index
    %42 = vector.load %arg8[%c0_22, %c0_23] : memref<8x32xf32, #tpu.memory_space<vmem>>, vector<8x32xf32>
    tpu.vector_store %arg8[%c0_22, %c0_23], %41 {strides = array<i32>} : memref<8x32xf32, #tpu.memory_space<vmem>>, vector<8x32xf32>,
    return
  }
  func.func @transform_0(%arg0: i32) -> (i32, i32) {
    %c0_i32 = arith.constant 0 : i32
    %c0_i32_0 = arith.constant 0 : i32
    return %arg0, %c0_i32 : i32, i32
  }
  func.func @transform_1(%arg0: i32) -> (i32, i32) {
    %c0_i32 = arith.constant 0 : i32
    %c0_i32_0 = arith.constant 0 : i32
    %c0_i32_1 = arith.constant 0 : i32
    return %c0_i32, %c0_i32_0 : i32, i32
  }
  func.func @transform_2(%arg0: i32) -> (i32, i32) {
    %c0_i32 = arith.constant 0 : i32
    %c0_i32_0 = arith.constant 0 : i32
    %c0_i32_1 = arith.constant 0 : i32
    return %c0_i32, %c0_i32_0 : i32, i32
  }
  func.func @transform_3(%arg0: i32) -> (i32, i32) {
    %c0_i32 = arith.constant 0 : i32
    %c0_i32_0 = arith.constant 0 : i32
    %c0_i32_1 = arith.constant 0 : i32
    return %c0_i32, %c0_i32_0 : i32, i32
  }
  func.func @transform_4(%arg0: i32) -> (i32, i32) {
    %c0_i32 = arith.constant 0 : i32
    %c0_i32_0 = arith.constant 0 : i32
    %c0_i32_1 = arith.constant 0 : i32
    return %c0_i32, %c0_i32_0 : i32, i32
  }
  func.func @transform_5(%arg0: i32) -> (i32, i32) {
    %c0_i32 = arith.constant 0 : i32
    %c0_i32_0 = arith.constant 0 : i32
    %c0_i32_1 = arith.constant 0 : i32
    return %c0_i32, %c0_i32_0 : i32, i32
  }
  func.func @transform_6(%arg0: i32) -> (i32, i32) {
    %c0_i32 = arith.constant 0 : i32
    %c0_i32_0 = arith.constant 0 : i32
    %c0_i32_1 = arith.constant 0 : i32
    return %c0_i32, %c0_i32_0 : i32, i32
  }
  func.func @transform_7(%arg0: i32) -> (i32, i32) {
    %c0_i32 = arith.constant 0 : i32
    %c0_i32_0 = arith.constant 0 : i32
    return %arg0, %c0_i32 : i32, i32
  }
}

module attributes {stable_mosaic.version = 11 : i64} {
  func.func @vision_adapter_kernel(%arg0: i32, %arg1: memref<8x32xf32, #tpu.memory_space<vmem>>, %arg2: memref<32x128xf32, #tpu.memory_space<vmem>>, %arg3: memref<1x128xf32, #tpu.memory_space<vmem>>, %arg4: memref<128x32xf32, #tpu.memory_space<vmem>>, %arg5: memref<1x32xf32, #tpu.memory_space<vmem>>, %arg6: memref<1x32xf32, #tpu.memory_space<vmem>>, %arg7: memref<1x32xf32, #tpu.memory_space<vmem>>, %arg8: memref<8x32xf32, #tpu.memory_space<vmem>>) attributes {dimension_semantics = [#tpu.dimension_semantics<parallel>], iteration_bounds = array<i64: 2>, scalar_prefetch = 0 : i64, scratch_operands = 0 : i64, tpu.core_type = #tpu.core_type<tc>, window_params = [{transform_indices = @transform_0, window_bounds = array<i64: 8, 32>}, {pipeline_mode = #tpu.pipeline_mode<synchronous>, transform_indices = @transform_1, window_bounds = array<i64: 32, 128>}, {pipeline_mode = #tpu.pipeline_mode<synchronous>, transform_indices = @transform_2, window_bounds = array<i64: 1, 128>}, {pipeline_mode = #tpu.pipeline_mode<synchronous>, transform_indices = @transform_3, window_bounds = array<i64: 128, 32>}, {pipeline_mode = #tpu.pipeline_mode<synchronous>, transform_indices = @transform_4, window_bounds = array<i64: 1, 32>}, {pipeline_mode = #tpu.pipeline_mode<synchronous>, transform_indices = @transform_5, window_bounds = array<i64: 1, 32>}, {pipeline_mode = #tpu.pipeline_mode<synchronous>, transform_indices = @transform_6, window_bounds = array<i64: 1, 32>}, {transform_indices = @transform_7, window_bounds = array<i64: 8, 32>}]} {
    %c0 = arith.constant 0 : index
    %c0_0 = arith.constant 0 : index
    %0 = vector.load %arg1[%c0, %c0_0] : memref<8x32xf32, #tpu.memory_space<vmem>>, vector<8x32xf32>
    %c0_1 = arith.constant 0 : index
    %c0_2 = arith.constant 0 : index
    %1 = vector.load %arg2[%c0_1, %c0_2] : memref<32x128xf32, #tpu.memory_space<vmem>>, vector<32x128xf32>
    %cst = arith.constant dense<0.000000e+00> : vector<8x128xf32>
    %2 = tpu.matmul %0, %1, %cst {dimension_numbers = #tpu.dot_dimension_numbers<[1], [0], [0], [1], [0, 0, 1, 1], [], []>} : vector<8x32xf32>, vector<32x128xf32>, vector<8x128xf32> -> vector<8x128xf32>
    %c0_3 = arith.constant 0 : index
    %c0_4 = arith.constant 0 : index
    %3 = vector.load %arg3[%c0_3, %c0_4] : memref<1x128xf32, #tpu.memory_space<vmem>>, vector<1x128xf32>
    %4 = vector.broadcast %3 : vector<1x128xf32> to vector<8x128xf32>
    %5 = arith.addf %2, %4 : vector<8x128xf32>
    %cst_5 = arith.constant 5.000000e-01 : f32
    %6 = vector.broadcast %cst_5 : f32 to vector<8x128xf32>
    %7 = arith.mulf %6, %5 : vector<8x128xf32>
    %cst_6 = arith.constant 0.707106769 : f32
    %8 = vector.broadcast %cst_6 : f32 to vector<8x128xf32>
    %9 = arith.mulf %5, %8 : vector<8x128xf32>
    %10 = math.erf %9 : vector<8x128xf32>
    %cst_7 = arith.constant 1.000000e+00 : f32
    %11 = vector.broadcast %cst_7 : f32 to vector<8x128xf32>
    %12 = arith.addf %11, %10 : vector<8x128xf32>
    %13 = arith.mulf %7, %12 : vector<8x128xf32>
    %c0_8 = arith.constant 0 : index
    %c0_9 = arith.constant 0 : index
    %14 = vector.load %arg4[%c0_8, %c0_9] : memref<128x32xf32, #tpu.memory_space<vmem>>, vector<128x32xf32>
    %cst_10 = arith.constant dense<0.000000e+00> : vector<8x32xf32>
    %15 = tpu.matmul %13, %14, %cst_10 {dimension_numbers = #tpu.dot_dimension_numbers<[1], [0], [0], [1], [0, 0, 1, 1], [], []>} : vector<8x128xf32>, vector<128x32xf32>, vector<8x32xf32> -> vector<8x32xf32>
    %c0_11 = arith.constant 0 : index
    %c0_12 = arith.constant 0 : index
    %16 = vector.load %arg5[%c0_11, %c0_12] : memref<1x32xf32, #tpu.memory_space<vmem>>, vector<1x32xf32>
    %17 = vector.broadcast %16 : vector<1x32xf32> to vector<8x32xf32>
    %18 = arith.addf %15, %17 : vector<8x32xf32>
    %19 = arith.addf %18, %0 : vector<8x32xf32>
    %cst_13 = arith.constant dense<0.000000e+00> : vector<8xf32>
    %20 = vector.multi_reduction <add>, %19, %cst_13 [1] : vector<8x32xf32> to vector<8xf32>
    %21 = vector.shape_cast %20 : vector<8xf32> to vector<8x1xf32>
    %cst_14 = arith.constant 3.125000e-02 : f32
    %22 = vector.broadcast %cst_14 : f32 to vector<8x1xf32>
    %23 = arith.mulf %21, %22 : vector<8x1xf32>
    %24 = vector.broadcast %23 : vector<8x1xf32> to vector<8x32xf32>
    %25 = arith.subf %19, %24 : vector<8x32xf32>
    %26 = arith.mulf %25, %25 : vector<8x32xf32>
    %cst_15 = arith.constant dense<0.000000e+00> : vector<8xf32>
    %27 = vector.multi_reduction <add>, %26, %cst_15 [1] : vector<8x32xf32> to vector<8xf32>
    %28 = vector.shape_cast %27 : vector<8xf32> to vector<8x1xf32>
    %cst_16 = arith.constant 3.125000e-02 : f32
    %29 = vector.broadcast %cst_16 : f32 to vector<8x1xf32>
    %30 = arith.mulf %28, %29 : vector<8x1xf32>
    %cst_17 = arith.constant 9.99999974E-6 : f32
    %31 = vector.broadcast %cst_17 : f32 to vector<8x1xf32>
    %32 = arith.addf %30, %31 : vector<8x1xf32>
    %33 = math.rsqrt %32 : vector<8x1xf32>
    %34 = vector.broadcast %33 : vector<8x1xf32> to vector<8x32xf32>
    %35 = arith.mulf %25, %34 : vector<8x32xf32>
    %c0_18 = arith.constant 0 : index
    %c0_19 = arith.constant 0 : index
    %36 = vector.load %arg6[%c0_18, %c0_19] : memref<1x32xf32, #tpu.memory_space<vmem>>, vector<1x32xf32>
    %37 = vector.broadcast %36 : vector<1x32xf32> to vector<8x32xf32>
    %38 = arith.mulf %35, %37 : vector<8x32xf32>
    %c0_20 = arith.constant 0 : index
    %c0_21 = arith.constant 0 : index
    %39 = vector.load %arg7[%c0_20, %c0_21] : memref<1x32xf32, #tpu.memory_space<vmem>>, vector<1x32xf32>
    %40 = vector.broadcast %39 : vector<1x32xf32> to vector<8x32xf32>
    %41 = arith.addf %38, %40 : vector<8x32xf32>
    %c0_22 = arith.constant 0 : index
    %c0_23 = arith.constant 0 : index
    %42 = vector.load %arg8[%c0_22, %c0_23] : memref<8x32xf32, #tpu.memory_space<vmem>>, vector<8x32xf32>
    tpu.vector_store %arg8[%c0_22, %c0_23], %41 {strides = array<i32>} : memref<8x32xf32, #tpu.memory_space<vmem>>, vector<8x32xf32>,
    return
  }
  func.func @transform_0(%arg0: i32) -> (i32, i32) {
    %c0_i32 = arith.constant 0 : i32
    %c0_i32_0 = arith.constant 0 : i32
    return %arg0, %c0_i32 : i32, i32
  }
  func.func @transform_1(%arg0: i32) -> (i32, i32) {
    %c0_i32 = arith.constant 0 : i32
    %c0_i32_0 = arith.constant 0 : i32
    %c0_i32_1 = arith.constant 0 : i32
    return %c0_i32, %c0_i32_0 : i32, i32
  }
  func.func @transform_2(%arg0: i32) -> (i32, i32) {
    %c0_i32 = arith.constant 0 : i32
    %c0_i32_0 = arith.constant 0 : i32
    %c0_i32_1 = arith.constant 0 : i32
    return %c0_i32, %c0_i32_0 : i32, i32
  }
  func.func @transform_3(%arg0: i32) -> (i32, i32) {
    %c0_i32 = arith.constant 0 : i32
    %c0_i32_0 = arith.constant 0 : i32
    %c0_i32_1 = arith.constant 0 : i32
    return %c0_i32, %c0_i32_0 : i32, i32
  }
  func.func @transform_4(%arg0: i32) -> (i32, i32) {
    %c0_i32 = arith.constant 0 : i32
    %c0_i32_0 = arith.constant 0 : i32
    %c0_i32_1 = arith.constant 0 : i32
    return %c0_i32, %c0_i32_0 : i32, i32
  }
  func.func @transform_5(%arg0: i32) -> (i32, i32) {
    %c0_i32 = arith.constant 0 : i32
    %c0_i32_0 = arith.constant 0 : i32
    %c0_i32_1 = arith.constant 0 : i32
    return %c0_i32, %c0_i32_0 : i32, i32
  }
  func.func @transform_6(%arg0: i32) -> (i32, i32) {
    %c0_i32 = arith.constant 0 : i32
    %c0_i32_0 = arith.constant 0 : i32
    %c0_i32_1 = arith.constant 0 : i32
    return %c0_i32, %c0_i32_0 : i32, i32
  }
  func.func @transform_7(%arg0: i32) -> (i32, i32) {
    %c0_i32 = arith.constant 0 : i32
    %c0_i32_0 = arith.constant 0 : i32
    return %arg0, %c0_i32 : i32, i32
  }
}

</mosaic_0001>

<bundles_post_ra>
// kernel: tpu_custom_call.1
= control target key start
LH: loop header
LB: loop body
LE: loop exit
PB: predicated region body
PF: predicated region fallthrough
CT: control target
= control target key end

     0   :  { %12 = vsyncpa [#allocation3], 0  ;;  %s1005_s0 = inlined_call_operand.vmem [shape: f32[16,32], index: 0, kind: input, shape index: {}]   ;;  %s1006_s1 = inlined_call_operand.vmem [shape: f32[32,128], index: 1, kind: input, shape index: {}]   ;;  %s1007_s2 = inlined_call_operand.vmem [shape: f32[1,128], index: 2, kind: input, shape index: {}]   ;;  %s1008_s3 = inlined_call_operand.vmem [shape: f32[128,32], index: 3, kind: input, shape index: {}]   ;;  %s1009_s4 = inlined_call_operand.vmem [shape: f32[1,32], index: 4, kind: input, shape index: {}]   ;;  %s1010_s5 = inlined_call_operand.vmem [shape: f32[1,32], index: 5, kind: input, shape index: {}]   ;;  %s1011_s6 = inlined_call_operand.vmem [shape: f32[1,32], index: 6, kind: input, shape index: {}]   ;;  %s1012_s7 = inlined_call_operand.hbm [shape: f32[16,32], index: 7, kind: output, shape index: {}]  }
   0x1   :  { %14 = vsyncpa [#allocation3 + $0x1], 0  ;;  %s829_s24 = smov 0   ;;  %s831_s25 = smov 0  }
   0x2   :  { %s833_s26 = smov 0   ;;  %s835_s27 = smov 0  }
   0x3 LB: > { %s850_s28 = sadd.s32 4294967295, %s783_s27   ;;  %s562_s29 = sadd.s32 4294967294, %s783_s27   ;;  %s783_s27 = sphi %s835_s27, %s1018_s27   ;;  %s779_s26 = sphi %s833_s26, %s1017_s26   ;;  %s775_s25 = sphi %s831_s25, %s1016_s25   ;;  %s771_s24 = sphi %s829_s24, %s1015_s24  }
   0x4   : > { %s854_s30 = sadd.s32 1, %s783_s27   ;;  %s179_s8 = sadd.s32 1, %s779_s26 }
   0x5   : > { %s176_s9 = ssub.s32 %s783_s27, %s854_s30  ;;  %p189_p0 = scmp.ne.s32.totalorder %s779_s26, %s775_s25 }
   0x6   : > { %p177_p1 = scmp.eq.s32.totalorder %s176_s9, 0  ;;  %p190_p2 = scmp.eq.s32.totalorder %s850_s28, 1 }
   0x7   : > { %p195_p3 = scmp.ne.s32.totalorder %s775_s25, %s771_s24  ;;  %p196_p4 = scmp.eq.s32.totalorder %s562_s29, 1 }
   0x8   : > { %s865_s10 = scalar_select %p177_p1, %s779_s26, %s179_s8  }
   0x9   : > { %p867_p5 = por %p190_p2, %p189_p0  ;;  %p871_p6 = por %p196_p4, %p195_p3 }
   0xa   : > { %p565_p7 = scmp.ge.s32.totalorder %s783_s27, 1  ;;  %p239_p8 = scmp.lt.s32.totalorder %s783_s27, 3 }
   0xc   : > { %p240_p9 = pnand %p565_p7, %p239_p8 }
   0xd   : > { %v275_v0 = vld [vmem:[%s1006_s1] sm:$0xff] (!%p240_p9)  ;;  %v276_v1 = vld [vmem:[%s1006_s1 + $0x8] sm:$0xff] (!%p240_p9)  ;;  %v277_v2 = vld [vmem:[%s1006_s1 + $0x10] sm:$0xff] (!%p240_p9)  ;;  %v785_v3 = vmov (!%p240_p9), 0.0|0.0   ;;  %vm786_vm0 = vmmov (!%p240_p9), 0   ;;  %v787_v6 = vmov (!%p240_p9), 0.0  }
   0xe   : > { %243 = sbr.rel (%p240_p9) target bundleno = 800 (0x320), region = 48  ;;  %645 = vmatprep.subr.bf16.mxu0 (!%p240_p9), %v785_v3  ;;  %v646_v4 = vpack.c.bf16 (!%p240_p9), %v276_v1, %v275_v0  ;;  %v278_v5 = vld [vmem:[%s1006_s1 + $0x18] sm:$0xff] (!%p240_p9)  ;;  %607 = vmatprep.mubr.msk.f32.mxu0 (!%p240_p9), %vm786_vm0, %v787_v6  ;;  %p270_p10 = scmp.lt.s32.totalorder (!%p240_p9), %s850_s28, 1  ;;  %v365_v7 = vld [vmem:[%s1008_s3] sm:$0xff] (!%p240_p9)  ;;  %v366_v8 = vld [vmem:[%s1008_s3 + $0x8] sm:$0xff] (!%p240_p9)  ;;  %vm286_vm1 = vcmask (!%p240_p9), 261120  }
   0xf   : > { %651 = vmatprep.subr.bf16.mxu1 (!%p240_p9), %v785_v3  ;;  %v652_v9 = vpack.c.bf16 (!%p240_p9), %v366_v8, %v365_v7  ;;  %v367_v10 = vld [vmem:[%s1008_s3 + $0x10] sm:$0xff] (!%p240_p9)  ;;  %v368_v11 = vld [vmem:[%s1008_s3 + $0x18] sm:$0xff] (!%p240_p9)  ;;  %642 = vmatprep.mubr.msk.f32.mxu1 (!%p240_p9), %vm786_vm0, %v787_v6  ;;  %v649_v12 = vpack.c.bf16 (!%p240_p9), %v278_v5, %v277_v2  ;;  %v369_v14 = vld [vmem:[%s1008_s3 + $0x20] sm:$0xff] (!%p240_p9)  ;;  %s267_s20 = sand.u32 (!%p240_p9), 1, %s775_s25   ;;  %s574_s9 = sshll.u32 (!%p240_p9), %s850_s28, 7 }
  0x10   : > { %647 = vmatpush3.bf16.msra.mxu0 (!%p240_p9), %v646_v4  ;;  %v655_v13 = vpack.c.bf16 (!%p240_p9), %v368_v11, %v367_v10  ;;  %v370_v15 = vld [vmem:[%s1008_s3 + $0x28] sm:$0xff] (!%p240_p9)  ;;  %v371_v18 = vld [vmem:[%s1008_s3 + $0x30] sm:$0xff] (!%p240_p9)  ;;  %v372_v19 = vld [vmem:[%s1008_s3 + $0x38] sm:$0xff] (!%p240_p9)  ;;  %s566_s21 = sshll.u32 (!%p240_p9), %s267_s20, 3  ;;  %s962_s17 = scalar_lea.hbm (!%p240_p9), %s1012_s7, %s574_s9 }
  0x11   : > { %648 = vmatprep.subr.bf16.mxu0 (!%p240_p9), %v785_v3  ;;  %653 = vmatpush3.bf16.msra.mxu1 (!%p240_p9), %v652_v9  ;;  %v658_v17 = vpack.c.bf16 (!%p240_p9), %v370_v15, %v369_v14  ;;  %v661_v20 = vpack.c.bf16 (!%p240_p9), %v372_v19, %v371_v18  ;;  %v373_v21 = vld [vmem:[%s1008_s3 + $0x40] sm:$0xff] (!%p240_p9)  ;;  %v374_v22 = vld [vmem:[%s1008_s3 + $0x48] sm:$0xff] (!%p240_p9)  ;;  %v375_v24 = vld [vmem:[%s1008_s3 + $0x50] sm:$0xff] (!%p240_p9)  ;;  %s269_s13 = scalar_lea.vmem (!%p240_p9), [#allocation2], %s566_s21  ;;  %s490_s18 = scalar_lea.sflag (!%p240_p9), [#allocation3], %s267_s20 }
  0x12   : > { %654 = vmatprep.subr.bf16.mxu1 (!%p240_p9), %v785_v3  ;;  %v664_v23 = vpack.c.bf16 (!%p240_p9), %v374_v22, %v373_v21  ;;  %v376_v25 = vld [vmem:[%s1008_s3 + $0x58] sm:$0xff] (!%p240_p9)  ;;  %v377_v27 = vld [vmem:[%s1008_s3 + $0x60] sm:$0xff] (!%p240_p9)  ;;  %v378_v28 = vld [vmem:[%s1008_s3 + $0x68] sm:$0xff] (!%p240_p9)  ;;  %s503_s14 = sshll.u32 (!%p240_p9), %s269_s13, 4  ;;  %s964_s14 = int_to_ptr.vmem [resolvable:$true] %s503_s14 }
  0x13   : > { %v667_v26 = vpack.c.bf16 (!%p240_p9), %v376_v25, %v375_v24  ;;  %v670_v29 = vpack.c.bf16 (!%p240_p9), %v378_v28, %v377_v27  ;;  %v379_v30 = vld [vmem:[%s1008_s3 + $0x70] sm:$0xff] (!%p240_p9)  ;;  %v380_v31 = vld [vmem:[%s1008_s3 + $0x78] sm:$0xff] (!%p240_p9)  ;;  %v568_v33 = vld [vmem:[%s1007_s2] ss:$0 sm:$0xff] (!%p240_p9)  ;;  %s721_s19 = scalar_lea.vmem (!%p240_p9), %s964_s14, 128 }
  0x14   : > { %650 = vmatpush3.bf16.msra.mxu0 (!%p240_p9), %v649_v12  ;;  %v673_v32 = vpack.c.bf16 (!%p240_p9), %v380_v31, %v379_v30  ;;  %v570_v42 = vld [vmem:[%s1009_s4] ss:$0 sm:$0xff] (!%p240_p9)  ;;  %p722_p11 = scmp.ne.s32.totalorder (!%p240_p9), %s964_s14, %s721_s19 }
  0x15   : > { %s271_s15 = scalar_select %p270_p10, %s850_s28, 1  ;;  %656 = vmatpush3.bf16.msra.mxu1 %v655_v13  ;;  %v571_v57 = vld [vmem:[%s1010_s5] ss:$0 sm:$0xff] }
  0x16   : > { %657 = vmatprep.subr.bf16.mxu1 %v785_v3  ;;  %v572_v59 = vld [vmem:[%s1011_s6] ss:$0 sm:$0xff]  ;;  %p723_p12 = pnand %p722_p11, %p867_p5  ;;  %s788_s28 = smov [#allocation2]  }
  0x17   : > { %s567_s16 = sshll.u32 %s271_s15, 3  ;;  %s725_s21 = sshll.u32 %s788_s28, 4  ;;  %s726_s21 = int_to_ptr.vmem [resolvable:$false] %s725_s21 }
  0x18   : > { %s273_s23 = scalar_lea.vmem %s1005_s0, %s567_s16  ;;  %p724_p13 = pneg %p723_p12 }
  0x19   : > { %v274_v16 = vld [vmem:[%s273_s23] sm:$0xff]  ;;  %659 = vmatpush3.bf16.msra.mxu1 %v658_v17  ;;  %s727_s22 = scalar_lea.vmem %s726_s21, 256  ;;  %p728_p0 = scmp.lt.s32.totalorder %s964_s14, %s726_s21 }
  0x1a   : > { %608 = vmatmul.mubr.msk.f32.vlgmr.msra.gmra.mrb[0].mxu0 %vm286_vm1, %v274_v16  ;;  %660 = vmatprep.subr.bf16.mxu1 %v785_v3  ;;  %p729_p1 = scmp.lt.s32.totalorder %s727_s22, %s721_s19 }
  0x1c   : > { %p730_p2 = por %p729_p1, %p728_p0 }
  0x1d   : > { %662 = vmatpush3.bf16.msra.mxu1 %v661_v20 }
  0x1e   : > { %663 = vmatprep.subr.bf16.mxu1 %v785_v3  ;;  %p731_p3 = pnand %p730_p2, %p724_p13 }
  0x21   : > { %665 = vmatpush3.bf16.msra.mxu1 %v664_v23 }
  0x22   : > { %666 = vmatprep.subr.bf16.mxu1 %v785_v3 }
  0x25   : > { %668 = vmatpush3.bf16.msra.mxu1 %v667_v26 }
  0x26   : > { %669 = vmatprep.subr.bf16.mxu1 %v785_v3 }
  0x29   : > { %671 = vmatpush3.bf16.msra.mxu1 %v670_v29 }
  0x2a   : > { %672 = vmatprep.subr.bf16.mxu1 %v785_v3 }
  0x2d   : > { %674 = vmatpush3.bf16.msra.mxu1 %v673_v32 }
  0xed   : > { %v356_v34 = vpop.f32.mrb[0].mxu0 }
  0xee   : > { %v357_v35 = vadd.f32 %v568_v33, %v356_v34  ;;  %v609_v36 = vpop.f32.mrb[1].mxu0 }
  0xf0   : > { %v361_v37 = vmul.f32 0.70710677, %v357_v35  ;;  %v360_v39 = vmul.f32 0.5, %v357_v35 }
  0xf2   : > { %717 = verf.f32 %v361_v37 }
  0xfc   : > { %v718_v38 = vpop.eup %717 }
  0xfd   : > { %v363_v40 = vadd.f32 1.0, %v718_v38 }
  0xff   : > { %v364_v41 = vmul.f32 %v363_v40, %v360_v39 }
 0x101   : > { %643 = vmatmul.mubr.f32.vlgmr.msra.gmra.mrb[0].mxu1 %v364_v41 }
 0x1d4   : > { %v454_v43 = vpop.f32.mrb[0].mxu1 }
 0x1d5   : > { %v455_v44 = vadd.f32 %v570_v42, %v454_v43  ;;  %v644_v45 = vpop.f32.mrb[1].mxu1 }
 0x1d7   : > { %v458_v46 = vadd.f32 %v455_v44, %v274_v16 }
 0x1d9   : > { %v459_v47 = vsel %vm286_vm1, %v458_v46, 0.0 }
 0x1da   : > { %460 = vadd.xlane.f32.xlu0 %v459_v47 }
 0x267   : > { %v461_v48 = vpop.xlane.xlu0 %460 }
 0x268   : > { %v462_v49 = vmul.f32 0.03125, %v461_v48 }
 0x26a   : > { %v463_v50 = vsub.f32 %v458_v46, %v462_v49 }
 0x26c   : > { %v464_v51 = vmul.f32 %v463_v50, %v463_v50 }
 0x26e   : > { %v465_v52 = vsel %vm286_vm1, %v464_v51, 0.0 }
 0x26f   : > { %466 = vadd.xlane.f32.xlu0 %v465_v52 }
 0x2fc   : > { %v467_v53 = vpop.xlane.xlu0 %466 }
 0x2fd   : > { %v468_v54 = vmul.f32 0.03125, %v467_v53 }
 0x2ff   : > { %v469_v55 = vadd.f32 1e-05, %v468_v54 }
 0x301   : > { %719 = vrsqrt.f32 %v469_v55 }
 0x30b   : > { %v720_v56 = vpop.eup %719 }
 0x30c   : > { %v471_v58 = vmul.f32 %v720_v56, %v463_v50 }
 0x30e   : > { %v479_v60 = vmul.f32 %v571_v57, %v471_v58 }
 0x310   : > { %v487_v61 = vadd.f32 %v572_v59, %v479_v60 }
 0x312   : > { %488 = vst.msk [vmem:[%s269_s13] sm:$0xff] %vm286_vm1, %v487_v61 }
 0x313   : > { %734 = shalt.err (!%p731_p3)
}
 0x314   : > { %s735_s20 = scalar_lea.hbm %s962_s17, 128  ;;  %s739_s8 = scalar_lea.hbm %s1012_s7, 256 }
 0x315   : > { %p736_p4 = scmp.ne.s32.totalorder %s962_s17, %s735_s20  ;;  %p740_p9 = scmp.lt.u32.totalorder %s962_s17, %s1012_s7 }
 0x316   : > { %p741_p10 = scmp.lt.u32.totalorder %s739_s8, %s735_s20  ;;  %p743_p12 = scmp.lt.u32.totalorder %s735_s20, %s962_s17 }
 0x317   : > { %p737_p7 = pnand %p736_p4, %p867_p5 }
 0x318   : > { %p742_p11 = por %p741_p10, %p740_p9 }
 0x319   : > { %p738_p8 = pneg %p737_p7 }
 0x31a   : > { %p744_p13 = por %p743_p12, %p742_p11 }
 0x31c   : > { %p745_p0 = pnand %p744_p13, %p738_p8 }
 0x31e   : > { %748 = shalt.err (!%p745_p0)
}
 0x31f   : > { %675 = dma.vmem_to_hbm [thread:$0]  (%p867_p5), %s964_s14, 128, %s962_s17, %s490_s18  }
 0x320 PF: > { %p681_p1 = scmp.ge.s32.totalorder %s783_s27, 2  ;;  %s515_s15 = sand.u32 1, %s771_s24  }
 0x321   : > { %s516_s16 = scalar_lea.sflag [#allocation3], %s515_s15 }
 0x322   : > { %p678_p2 = pnand %p681_p1, %p871_p6 }
 0x324   : > { %766 = dma.done.wait (!%p678_p2), %s516_s16, 128  }
 0x325   : > { %768 = vsyncadd (!%p678_p2), %s516_s16, 4294967168  ;;  %p17_p3 = scmp.ge.s32.totalorder %s854_s30, 4   ;;  %s1015_s24 = smov %s775_s25 }
 0x326   : > { %s1016_s25 = smov %s779_s26  ;;  %s1017_s26 = smov %s865_s10 }
 0x327   : > { %s1018_s27 = smov %s854_s30  ;;  %19 = sbr.rel (!%p17_p3) target bundleno = 3 (0x3), region = 83 }
 0x32e   :  { %521 = vsyncpa [#allocation3], 1 }
 0x32f   :  { %523 = vsyncpa [#allocation3 + $0x1], 1 }

// kernel: tpu_custom_call.1
= control target key start
LH: loop header
LB: loop body
LE: loop exit
PB: predicated region body
PF: predicated region fallthrough
CT: control target
= control target key end

     0   :  { %12 = vsyncpa [#allocation3], 0  ;;  %s1005_s0 = inlined_call_operand.vmem [shape: f32[16,32], index: 0, kind: input, shape index: {}]   ;;  %s1006_s1 = inlined_call_operand.vmem [shape: f32[32,128], index: 1, kind: input, shape index: {}]   ;;  %s1007_s2 = inlined_call_operand.vmem [shape: f32[1,128], index: 2, kind: input, shape index: {}]   ;;  %s1008_s3 = inlined_call_operand.vmem [shape: f32[128,32], index: 3, kind: input, shape index: {}]   ;;  %s1009_s4 = inlined_call_operand.vmem [shape: f32[1,32], index: 4, kind: input, shape index: {}]   ;;  %s1010_s5 = inlined_call_operand.vmem [shape: f32[1,32], index: 5, kind: input, shape index: {}]   ;;  %s1011_s6 = inlined_call_operand.vmem [shape: f32[1,32], index: 6, kind: input, shape index: {}]   ;;  %s1012_s7 = inlined_call_operand.hbm [shape: f32[16,32], index: 7, kind: output, shape index: {}]  }
   0x1   :  { %14 = vsyncpa [#allocation3 + $0x1], 0  ;;  %s829_s24 = smov 0   ;;  %s831_s25 = smov 0  }
   0x2   :  { %s833_s26 = smov 0   ;;  %s835_s27 = smov 0  }
   0x3 LB: > { %s850_s28 = sadd.s32 4294967295, %s783_s27   ;;  %s562_s29 = sadd.s32 4294967294, %s783_s27   ;;  %s783_s27 = sphi %s835_s27, %s1018_s27   ;;  %s779_s26 = sphi %s833_s26, %s1017_s26   ;;  %s775_s25 = sphi %s831_s25, %s1016_s25   ;;  %s771_s24 = sphi %s829_s24, %s1015_s24  }
   0x4   : > { %s854_s30 = sadd.s32 1, %s783_s27   ;;  %s179_s8 = sadd.s32 1, %s779_s26 }
   0x5   : > { %s176_s9 = ssub.s32 %s783_s27, %s854_s30  ;;  %p189_p0 = scmp.ne.s32.totalorder %s779_s26, %s775_s25 }
   0x6   : > { %p177_p1 = scmp.eq.s32.totalorder %s176_s9, 0  ;;  %p190_p2 = scmp.eq.s32.totalorder %s850_s28, 1 }
   0x7   : > { %p195_p3 = scmp.ne.s32.totalorder %s775_s25, %s771_s24  ;;  %p196_p4 = scmp.eq.s32.totalorder %s562_s29, 1 }
   0x8   : > { %s865_s10 = scalar_select %p177_p1, %s779_s26, %s179_s8  }
   0x9   : > { %p867_p5 = por %p190_p2, %p189_p0  ;;  %p871_p6 = por %p196_p4, %p195_p3 }
   0xa   : > { %p565_p7 = scmp.ge.s32.totalorder %s783_s27, 1  ;;  %p239_p8 = scmp.lt.s32.totalorder %s783_s27, 3 }
   0xc   : > { %p240_p9 = pnand %p565_p7, %p239_p8 }
   0xd   : > { %v275_v0 = vld [vmem:[%s1006_s1] sm:$0xff] (!%p240_p9)  ;;  %v276_v1 = vld [vmem:[%s1006_s1 + $0x8] sm:$0xff] (!%p240_p9)  ;;  %v277_v2 = vld [vmem:[%s1006_s1 + $0x10] sm:$0xff] (!%p240_p9)  ;;  %v785_v3 = vmov (!%p240_p9), 0.0|0.0   ;;  %vm786_vm0 = vmmov (!%p240_p9), 0   ;;  %v787_v6 = vmov (!%p240_p9), 0.0  }
   0xe   : > { %243 = sbr.rel (%p240_p9) target bundleno = 800 (0x320), region = 48  ;;  %645 = vmatprep.subr.bf16.mxu0 (!%p240_p9), %v785_v3  ;;  %v646_v4 = vpack.c.bf16 (!%p240_p9), %v276_v1, %v275_v0  ;;  %v278_v5 = vld [vmem:[%s1006_s1 + $0x18] sm:$0xff] (!%p240_p9)  ;;  %607 = vmatprep.mubr.msk.f32.mxu0 (!%p240_p9), %vm786_vm0, %v787_v6  ;;  %p270_p10 = scmp.lt.s32.totalorder (!%p240_p9), %s850_s28, 1  ;;  %v365_v7 = vld [vmem:[%s1008_s3] sm:$0xff] (!%p240_p9)  ;;  %v366_v8 = vld [vmem:[%s1008_s3 + $0x8] sm:$0xff] (!%p240_p9)  ;;  %vm286_vm1 = vcmask (!%p240_p9), 261120  }
   0xf   : > { %651 = vmatprep.subr.bf16.mxu1 (!%p240_p9), %v785_v3  ;;  %v652_v9 = vpack.c.bf16 (!%p240_p9), %v366_v8, %v365_v7  ;;  %v367_v10 = vld [vmem:[%s1008_s3 + $0x10] sm:$0xff] (!%p240_p9)  ;;  %v368_v11 = vld [vmem:[%s1008_s3 + $0x18] sm:$0xff] (!%p240_p9)  ;;  %642 = vmatprep.mubr.msk.f32.mxu1 (!%p240_p9), %vm786_vm0, %v787_v6  ;;  %v649_v12 = vpack.c.bf16 (!%p240_p9), %v278_v5, %v277_v2  ;;  %v369_v14 = vld [vmem:[%s1008_s3 + $0x20] sm:$0xff] (!%p240_p9)  ;;  %s267_s20 = sand.u32 (!%p240_p9), 1, %s775_s25   ;;  %s574_s9 = sshll.u32 (!%p240_p9), %s850_s28, 7 }
  0x10   : > { %647 = vmatpush3.bf16.msra.mxu0 (!%p240_p9), %v646_v4  ;;  %v655_v13 = vpack.c.bf16 (!%p240_p9), %v368_v11, %v367_v10  ;;  %v370_v15 = vld [vmem:[%s1008_s3 + $0x28] sm:$0xff] (!%p240_p9)  ;;  %v371_v18 = vld [vmem:[%s1008_s3 + $0x30] sm:$0xff] (!%p240_p9)  ;;  %v372_v19 = vld [vmem:[%s1008_s3 + $0x38] sm:$0xff] (!%p240_p9)  ;;  %s566_s21 = sshll.u32 (!%p240_p9), %s267_s20, 3  ;;  %s962_s17 = scalar_lea.hbm (!%p240_p9), %s1012_s7, %s574_s9 }
  0x11   : > { %648 = vmatprep.subr.bf16.mxu0 (!%p240_p9), %v785_v3  ;;  %653 = vmatpush3.bf16.msra.mxu1 (!%p240_p9), %v652_v9  ;;  %v658_v17 = vpack.c.bf16 (!%p240_p9), %v370_v15, %v369_v14  ;;  %v661_v20 = vpack.c.bf16 (!%p240_p9), %v372_v19, %v371_v18  ;;  %v373_v21 = vld [vmem:[%s1008_s3 + $0x40] sm:$0xff] (!%p240_p9)  ;;  %v374_v22 = vld [vmem:[%s1008_s3 + $0x48] sm:$0xff] (!%p240_p9)  ;;  %v375_v24 = vld [vmem:[%s1008_s3 + $0x50] sm:$0xff] (!%p240_p9)  ;;  %s269_s13 = scalar_lea.vmem (!%p240_p9), [#allocation2], %s566_s21  ;;  %s490_s18 = scalar_lea.sflag (!%p240_p9), [#allocation3], %s267_s20 }
  0x12   : > { %654 = vmatprep.subr.bf16.mxu1 (!%p240_p9), %v785_v3  ;;  %v664_v23 = vpack.c.bf16 (!%p240_p9), %v374_v22, %v373_v21  ;;  %v376_v25 = vld [vmem:[%s1008_s3 + $0x58] sm:$0xff] (!%p240_p9)  ;;  %v377_v27 = vld [vmem:[%s1008_s3 + $0x60] sm:$0xff] (!%p240_p9)  ;;  %v378_v28 = vld [vmem:[%s1008_s3 + $0x68] sm:$0xff] (!%p240_p9)  ;;  %s503_s14 = sshll.u32 (!%p240_p9), %s269_s13, 4  ;;  %s964_s14 = int_to_ptr.vmem [resolvable:$true] %s503_s14 }
  0x13   : > { %v667_v26 = vpack.c.bf16 (!%p240_p9), %v376_v25, %v375_v24  ;;  %v670_v29 = vpack.c.bf16 (!%p240_p9), %v378_v28, %v377_v27  ;;  %v379_v30 = vld [vmem:[%s1008_s3 + $0x70] sm:$0xff] (!%p240_p9)  ;;  %v380_v31 = vld [vmem:[%s1008_s3 + $0x78] sm:$0xff] (!%p240_p9)  ;;  %v568_v33 = vld [vmem:[%s1007_s2] ss:$0 sm:$0xff] (!%p240_p9)  ;;  %s721_s19 = scalar_lea.vmem (!%p240_p9), %s964_s14, 128 }
  0x14   : > { %650 = vmatpush3.bf16.msra.mxu0 (!%p240_p9), %v649_v12  ;;  %v673_v32 = vpack.c.bf16 (!%p240_p9), %v380_v31, %v379_v30  ;;  %v570_v42 = vld [vmem:[%s1009_s4] ss:$0 sm:$0xff] (!%p240_p9)  ;;  %p722_p11 = scmp.ne.s32.totalorder (!%p240_p9), %s964_s14, %s721_s19 }
  0x15   : > { %s271_s15 = scalar_select %p270_p10, %s850_s28, 1  ;;  %656 = vmatpush3.bf16.msra.mxu1 %v655_v13  ;;  %v571_v57 = vld [vmem:[%s1010_s5] ss:$0 sm:$0xff] }
  0x16   : > { %657 = vmatprep.subr.bf16.mxu1 %v785_v3  ;;  %v572_v59 = vld [vmem:[%s1011_s6] ss:$0 sm:$0xff]  ;;  %p723_p12 = pnand %p722_p11, %p867_p5  ;;  %s788_s28 = smov [#allocation2]  }
  0x17   : > { %s567_s16 = sshll.u32 %s271_s15, 3  ;;  %s725_s21 = sshll.u32 %s788_s28, 4  ;;  %s726_s21 = int_to_ptr.vmem [resolvable:$false] %s725_s21 }
  0x18   : > { %s273_s23 = scalar_lea.vmem %s1005_s0, %s567_s16  ;;  %p724_p13 = pneg %p723_p12 }
  0x19   : > { %v274_v16 = vld [vmem:[%s273_s23] sm:$0xff]  ;;  %659 = vmatpush3.bf16.msra.mxu1 %v658_v17  ;;  %s727_s22 = scalar_lea.vmem %s726_s21, 256  ;;  %p728_p0 = scmp.lt.s32.totalorder %s964_s14, %s726_s21 }
  0x1a   : > { %608 = vmatmul.mubr.msk.f32.vlgmr.msra.gmra.mrb[0].mxu0 %vm286_vm1, %v274_v16  ;;  %660 = vmatprep.subr.bf16.mxu1 %v785_v3  ;;  %p729_p1 = scmp.lt.s32.totalorder %s727_s22, %s721_s19 }
  0x1c   : > { %p730_p2 = por %p729_p1, %p728_p0 }
  0x1d   : > { %662 = vmatpush3.bf16.msra.mxu1 %v661_v20 }
  0x1e   : > { %663 = vmatprep.subr.bf16.mxu1 %v785_v3  ;;  %p731_p3 = pnand %p730_p2, %p724_p13 }
  0x21   : > { %665 = vmatpush3.bf16.msra.mxu1 %v664_v23 }
  0x22   : > { %666 = vmatprep.subr.bf16.mxu1 %v785_v3 }
  0x25   : > { %668 = vmatpush3.bf16.msra.mxu1 %v667_v26 }
  0x26   : > { %669 = vmatprep.subr.bf16.mxu1 %v785_v3 }
  0x29   : > { %671 = vmatpush3.bf16.msra.mxu1 %v670_v29 }
  0x2a   : > { %672 = vmatprep.subr.bf16.mxu1 %v785_v3 }
  0x2d   : > { %674 = vmatpush3.bf16.msra.mxu1 %v673_v32 }
  0xed   : > { %v356_v34 = vpop.f32.mrb[0].mxu0 }
  0xee   : > { %v357_v35 = vadd.f32 %v568_v33, %v356_v34  ;;  %v609_v36 = vpop.f32.mrb[1].mxu0 }
  0xf0   : > { %v361_v37 = vmul.f32 0.70710677, %v357_v35  ;;  %v360_v39 = vmul.f32 0.5, %v357_v35 }
  0xf2   : > { %717 = verf.f32 %v361_v37 }
  0xfc   : > { %v718_v38 = vpop.eup %717 }
  0xfd   : > { %v363_v40 = vadd.f32 1.0, %v718_v38 }
  0xff   : > { %v364_v41 = vmul.f32 %v363_v40, %v360_v39 }
 0x101   : > { %643 = vmatmul.mubr.f32.vlgmr.msra.gmra.mrb[0].mxu1 %v364_v41 }
 0x1d4   : > { %v454_v43 = vpop.f32.mrb[0].mxu1 }
 0x1d5   : > { %v455_v44 = vadd.f32 %v570_v42, %v454_v43  ;;  %v644_v45 = vpop.f32.mrb[1].mxu1 }
 0x1d7   : > { %v458_v46 = vadd.f32 %v455_v44, %v274_v16 }
 0x1d9   : > { %v459_v47 = vsel %vm286_vm1, %v458_v46, 0.0 }
 0x1da   : > { %460 = vadd.xlane.f32.xlu0 %v459_v47 }
 0x267   : > { %v461_v48 = vpop.xlane.xlu0 %460 }
 0x268   : > { %v462_v49 = vmul.f32 0.03125, %v461_v48 }
 0x26a   : > { %v463_v50 = vsub.f32 %v458_v46, %v462_v49 }
 0x26c   : > { %v464_v51 = vmul.f32 %v463_v50, %v463_v50 }
 0x26e   : > { %v465_v52 = vsel %vm286_vm1, %v464_v51, 0.0 }
 0x26f   : > { %466 = vadd.xlane.f32.xlu0 %v465_v52 }
 0x2fc   : > { %v467_v53 = vpop.xlane.xlu0 %466 }
 0x2fd   : > { %v468_v54 = vmul.f32 0.03125, %v467_v53 }
 0x2ff   : > { %v469_v55 = vadd.f32 1e-05, %v468_v54 }
 0x301   : > { %719 = vrsqrt.f32 %v469_v55 }
 0x30b   : > { %v720_v56 = vpop.eup %719 }
 0x30c   : > { %v471_v58 = vmul.f32 %v720_v56, %v463_v50 }
 0x30e   : > { %v479_v60 = vmul.f32 %v571_v57, %v471_v58 }
 0x310   : > { %v487_v61 = vadd.f32 %v572_v59, %v479_v60 }
 0x312   : > { %488 = vst.msk [vmem:[%s269_s13] sm:$0xff] %vm286_vm1, %v487_v61 }
 0x313   : > { %734 = shalt.err (!%p731_p3)
}
 0x314   : > { %s735_s20 = scalar_lea.hbm %s962_s17, 128  ;;  %s739_s8 = scalar_lea.hbm %s1012_s7, 256 }
 0x315   : > { %p736_p4 = scmp.ne.s32.totalorder %s962_s17, %s735_s20  ;;  %p740_p9 = scmp.lt.u32.totalorder %s962_s17, %s1012_s7 }
 0x316   : > { %p741_p10 = scmp.lt.u32.totalorder %s739_s8, %s735_s20  ;;  %p743_p12 = scmp.lt.u32.totalorder %s735_s20, %s962_s17 }
 0x317   : > { %p737_p7 = pnand %p736_p4, %p867_p5 }
 0x318   : > { %p742_p11 = por %p741_p10, %p740_p9 }
 0x319   : > { %p738_p8 = pneg %p737_p7 }
 0x31a   : > { %p744_p13 = por %p743_p12, %p742_p11 }
 0x31c   : > { %p745_p0 = pnand %p744_p13, %p738_p8 }
 0x31e   : > { %748 = shalt.err (!%p745_p0)
}
 0x31f   : > { %675 = dma.vmem_to_hbm [thread:$0]  (%p867_p5), %s964_s14, 128, %s962_s17, %s490_s18  }
 0x320 PF: > { %p681_p1 = scmp.ge.s32.totalorder %s783_s27, 2  ;;  %s515_s15 = sand.u32 1, %s771_s24  }
 0x321   : > { %s516_s16 = scalar_lea.sflag [#allocation3], %s515_s15 }
 0x322   : > { %p678_p2 = pnand %p681_p1, %p871_p6 }
 0x324   : > { %766 = dma.done.wait (!%p678_p2), %s516_s16, 128  }
 0x325   : > { %768 = vsyncadd (!%p678_p2), %s516_s16, 4294967168  ;;  %p17_p3 = scmp.ge.s32.totalorder %s854_s30, 4   ;;  %s1015_s24 = smov %s775_s25 }
 0x326   : > { %s1016_s25 = smov %s779_s26  ;;  %s1017_s26 = smov %s865_s10 }
 0x327   : > { %s1018_s27 = smov %s854_s30  ;;  %19 = sbr.rel (!%p17_p3) target bundleno = 3 (0x3), region = 83 }
 0x32e   :  { %521 = vsyncpa [#allocation3], 1 }
 0x32f   :  { %523 = vsyncpa [#allocation3 + $0x1], 1 }

</bundles_post_ra>
